<compile_context>
chip_gen: v7x
topology: tpu7x:2x2x1
jax: 0.10.0
libtpu: 0.0.40
codegen_flags: <defaults>
</compile_context>

<pallas_src>
import functools
from math import ceil

import jax
import jax.numpy as jnp
import numpy as np
from jax.experimental import pallas as pl
from jax.experimental.pallas import tpu as pltpu

_VMEM_LIMIT = 48 * 1024 * 1024   # safe on v5e/v6e/v7x; raise to ~100MiB on v5e/v6e for big shapes


# ----------------------------------------------------------------------------
# Tiled projection matmul (to_qkv / to_out)
# ----------------------------------------------------------------------------

def _matmul_kernel(x_ref, w_ref, o_ref, acc_ref):
    @pl.when(pl.program_id(2) == 0)
    def _init():
        acc_ref[...] = jnp.zeros_like(acc_ref)

    acc_ref[...] += jnp.dot(x_ref[...], w_ref[...],
                            preferred_element_type=jnp.float32)

    @pl.when(pl.program_id(2) == pl.num_programs(2) - 1)
    def _store():
        o_ref[...] = acc_ref[...].astype(o_ref.dtype)


def _fit_tile(dim, want, align):
    """Largest of (want, dim) that tiles `dim` and respects TPU alignment;
    falls back to the full extent (always legal) otherwise."""
    t = min(want, dim)
    if dim % t == 0 and t % align == 0:
        return t
    return dim


def pallas_matmul(x, w, *, tm=256, tn=512, tk=512):
    M, K = x.shape
    K2, N = w.shape
    assert K == K2
    tm = _fit_tile(M, tm, 8)
    tn = _fit_tile(N, tn, 128)
    tk = _fit_tile(K, tk, 128)
    grid = (M // tm, N // tn, K // tk)
    return pl.pallas_call(
        _matmul_kernel,
        out_shape=jax.ShapeDtypeStruct((M, N), jnp.float32),
        grid=grid,
        in_specs=[pl.BlockSpec((tm, tk), lambda i, j, k: (i, k)),
                  pl.BlockSpec((tk, tn), lambda i, j, k: (k, j))],
        out_specs=pl.BlockSpec((tm, tn), lambda i, j, k: (i, j)),
        scratch_shapes=[pltpu.VMEM((tm, tn), jnp.float32)],
        compiler_params=pltpu.CompilerParams(
            dimension_semantics=("parallel", "parallel", "arbitrary"),
            vmem_limit_bytes=_VMEM_LIMIT),
    )(x, w)


# ----------------------------------------------------------------------------
# Nystrom attention core + residual depthwise conv (one (batch, head) / step)
# ----------------------------------------------------------------------------

def _nystrom_kernel(wconv_ref, p_ref, q_ref, k_ref, vpad_ref, o_ref, *,
                    pinv_iters, conv_k, n_seq, scale):
    hi = pl.program_id(1)
    pad = conv_k // 2
    f32 = jnp.float32

    q = q_ref[0, 0] * scale                 # (N, D), scale folded in-kernel
    k = k_ref[0, 0]                         # (N, D)
    vpad = vpad_ref[0, 0]                   # (N + 2*pad, D)
    v = vpad[pad:pad + n_seq, :]            # (N, D)
    P = p_ref[...]                          # (M, N), includes 1/l factor

    # landmark means
    q_land = jnp.dot(P, q, preferred_element_type=f32)   # (M, D)
    k_land = jnp.dot(P, k, preferred_element_type=f32)   # (M, D)

    def ab_t(a, b):   # a @ b.T, contracting the last (lane) dim of both
        return jax.lax.dot_general(a, b, (((1,), (1,)), ((), ())),
                                   preferred_element_type=f32)

    def softmax_last(x):
        m = jnp.max(x, axis=-1, keepdims=True)
        e = jnp.exp(x - m)
        return e / jnp.sum(e, axis=-1, keepdims=True)

    attn1 = softmax_last(ab_t(q, k_land))        # (N, M)
    attn2 = softmax_last(ab_t(q_land, k_land))   # (M, M)
    attn3 = softmax_last(ab_t(q_land, k))        # (M, N)

    # Moore-Penrose iterative pseudoinverse of attn2 (per-group norm init).
    M_ = attn2.shape[0]
    abs2 = jnp.abs(attn2)
    col = jnp.sum(abs2, axis=-1, keepdims=True)   # (M, 1)
    row = jnp.sum(abs2, axis=-2, keepdims=True)   # (1, M)
    denom = jnp.max(col) * jnp.max(row)
    z = jnp.swapaxes(attn2, -1, -2) / denom

    rr = jax.lax.broadcasted_iota(jnp.int32, (M_, M_), 0)
    cc = jax.lax.broadcasted_iota(jnp.int32, (M_, M_), 1)
    I = (rr == cc).astype(f32)

    for _ in range(pinv_iters):
        xz = jnp.dot(attn2, z, preferred_element_type=f32)
        t1 = 7.0 * I - xz
        t2 = 15.0 * I - jnp.dot(xz, t1, preferred_element_type=f32)
        t3 = 13.0 * I - jnp.dot(xz, t2, preferred_element_type=f32)
        z = 0.25 * jnp.dot(z, t3, preferred_element_type=f32)

    # out = (attn1 @ pinv(attn2)) @ (attn3 @ v)
    a1z = jnp.dot(attn1, z, preferred_element_type=f32)    # (N, M)
    a3v = jnp.dot(attn3, v, preferred_element_type=f32)    # (M, D)
    out = jnp.dot(a1z, a3v, preferred_element_type=f32)    # (N, D)

    # residual depthwise conv: K-tap shifted multiply-add over the seq axis
    conv = jnp.zeros_like(out)
    for t in range(conv_k):
        conv = conv + wconv_ref[hi, t] * vpad[t:t + n_seq, :]

    o_ref[0, 0] = out + conv


def pallas_nystrom_core(q, k, v_pad, P, w_conv, *, pinv_iters, conv_k, scale):
    b, h, N, D = q.shape
    Np = v_pad.shape[2]
    M = P.shape[0]
    kernel = functools.partial(_nystrom_kernel, pinv_iters=pinv_iters,
                               conv_k=conv_k, n_seq=N, scale=scale)
    return pl.pallas_call(
        kernel,
        out_shape=jax.ShapeDtypeStruct((b, h, N, D), jnp.float32),
        grid=(b, h),
        in_specs=[
            pl.BlockSpec(memory_space=pltpu.MemorySpace.SMEM),            # w_conv (h, K)
            pl.BlockSpec((M, N), lambda bi, hi: (0, 0)),                  # shared pooling matrix
            pl.BlockSpec((1, 1, N, D), lambda bi, hi: (bi, hi, 0, 0)),    # q
            pl.BlockSpec((1, 1, N, D), lambda bi, hi: (bi, hi, 0, 0)),    # k
            pl.BlockSpec((1, 1, Np, D), lambda bi, hi: (bi, hi, 0, 0)),   # v (seq-padded)
        ],
        out_specs=pl.BlockSpec((1, 1, N, D), lambda bi, hi: (bi, hi, 0, 0)),
        compiler_params=pltpu.CompilerParams(
            dimension_semantics=("parallel", "parallel"),
            vmem_limit_bytes=_VMEM_LIMIT),
    )(w_conv, P, q, k, v_pad)


# ----------------------------------------------------------------------------
# Module wrapper (glue in plain JAX, hot path in Pallas)
# ----------------------------------------------------------------------------

def nystrom_attention_forward(x, params, *, heads, dim_head, num_landmarks,
                              pinv_iterations, residual_conv_kernel):
    """x: (b, n, dim) float32.  Returns (b, n, dim)."""
    W_qkv = params["W_qkv"]          # (dim, 3*heads*dim_head)
    W_out = params["W_out"]          # (heads*dim_head, dim)
    w_conv = params["w_conv"]        # (heads, K)

    b, n, dim = x.shape
    h, d, m = heads, dim_head, num_landmarks
    inner = h * d
    scale = d ** -0.5

    # pad sequence at the FRONT so padded length is a multiple of m
    remainder = n % m
    if remainder > 0:
        x = jnp.pad(x, ((0, 0), (m - remainder, 0), (0, 0)))
    n_pad = x.shape[1]
    l = n_pad // m
    assert l == ceil(n / m)

    # qkv projection (tiled Pallas matmul)
    qkv = pallas_matmul(x.reshape(b * n_pad, dim), W_qkv)       # (b*n_pad, 3*inner)
    qkv = qkv.reshape(b, n_pad, 3, h, d)
    q = qkv[:, :, 0].transpose(0, 2, 1, 3)                      # (b, h, n_pad, d)
    k = qkv[:, :, 1].transpose(0, 2, 1, 3)
    v = qkv[:, :, 2].transpose(0, 2, 1, 3)

    # pre-pad v along seq for the K-tap residual conv (pad = K//2, multiple of 8)
    pad_c = residual_conv_kernel // 2
    v_pad = jnp.pad(v, ((0, 0), (0, 0), (pad_c, pad_c), (0, 0)))

    # single shared landmark pooling matrix (m, n_pad); 1/l folded in
    group = jnp.arange(n_pad) // l
    P = (jnp.arange(m)[:, None] == group[None, :]).astype(jnp.float32) / float(l)

    # attention core + residual conv (Pallas kernel, grid over (batch, heads))
    out = pallas_nystrom_core(q, k, v_pad, P, w_conv,
                              pinv_iters=pinv_iterations,
                              conv_k=residual_conv_kernel,
                              scale=scale)                      # (b, h, n_pad, d)

    # merge heads, output projection (tiled Pallas matmul), drop front padding
    out = out.transpose(0, 2, 1, 3).reshape(b * n_pad, inner)
    out = pallas_matmul(out, W_out).reshape(b, n_pad, dim)
    return out[:, -n:]


# ----------------------------------------------------------------------------
# Pure-JAX reference (mirrors the PyTorch module; pinv init per-group norms)
# ----------------------------------------------------------------------------

def _pinv_ref(x, iters):
    abs_x = jnp.abs(x)
    col = abs_x.sum(-1)                                   # (..., M)
    row = abs_x.sum(-2)                                   # (..., M)
    denom = col.max(-1) * row.max(-1)                     # (...)
    z = jnp.swapaxes(x, -1, -2) / denom[..., None, None]
    I = jnp.eye(x.shape[-1], dtype=x.dtype)
    for _ in range(iters):
        xz = x @ z
        z = 0.25 * z @ (13 * I - xz @ (15 * I - xz @ (7 * I - xz)))
    return z


def nystrom_attention_reference(x, params, *, heads, dim_head, num_landmarks,
                                pinv_iterations, residual_conv_kernel):
    W_qkv, W_out, w_conv = params["W_qkv"], params["W_out"], params["w_conv"]
    b, n, dim = x.shape
    h, d, m = heads, dim_head, num_landmarks
    inner = h * d
    scale = d ** -0.5

    remainder = n % m
    if remainder > 0:
        x = jnp.pad(x, ((0, 0), (m - remainder, 0), (0, 0)))
    n_pad = x.shape[1]
    l = n_pad // m

    qkv = x @ W_qkv
    q, k, v = jnp.split(qkv, 3, axis=-1)
    q, k, v = map(lambda t: t.reshape(b, n_pad, h, d).transpose(0, 2, 1, 3),
                  (q, k, v))
    q = q * scale

    q_land = q.reshape(b, h, m, l, d).sum(3) / l
    k_land = k.reshape(b, h, m, l, d).sum(3) / l

    attn1 = jax.nn.softmax(jnp.einsum('bhid,bhjd->bhij', q, k_land), axis=-1)
    attn2 = jax.nn.softmax(jnp.einsum('bhid,bhjd->bhij', q_land, k_land), axis=-1)
    attn3 = jax.nn.softmax(jnp.einsum('bhid,bhjd->bhij', q_land, k), axis=-1)

    z = _pinv_ref(attn2, pinv_iterations)
    out = (attn1 @ z) @ (attn3 @ v)

    # residual depthwise conv (cross-correlation) along sequence
    K_sz = residual_conv_kernel
    pad_c = K_sz // 2
    v_p = jnp.pad(v, ((0, 0), (0, 0), (pad_c, pad_c), (0, 0)))
    conv = jnp.zeros_like(v)
    for t in range(K_sz):
        conv = conv + w_conv[:, t][None, :, None, None] * v_p[:, :, t:t + n_pad, :]
    out = out + conv

    out = out.transpose(0, 2, 1, 3).reshape(b, n_pad, inner) @ W_out
    return out[:, -n:]


# ----------------------------------------------------------------------------
# Main
# ----------------------------------------------------------------------------

if __name__ == "__main__":
    batch = 2
    seq = 14
    dim = 32
    heads = 4
    dim_head = 16
    num_landmarks = 4
    pinv_iterations = 6
    residual_conv_kernel = 33
    inner = heads * dim_head

    key = jax.random.PRNGKey(0)
    k_qkv, k_out, k_conv, k_x = jax.random.split(key, 4)
    params = {
        "W_qkv": (jax.random.normal(k_qkv, (dim, 3 * inner), jnp.float32) * 0.05),
        "W_out": (jax.random.normal(k_out, (inner, dim), jnp.float32) * 0.05),
        "w_conv": (jax.random.normal(k_conv, (heads, residual_conv_kernel),
                                     jnp.float32) * 0.05),
    }
    x = jax.random.normal(k_x, (batch, seq, dim), jnp.float32)

    out = nystrom_attention_forward(
        x, params, heads=heads, dim_head=dim_head, num_landmarks=num_landmarks,
        pinv_iterations=pinv_iterations,
        residual_conv_kernel=residual_conv_kernel)
    out = jax.block_until_ready(out)

    ref = nystrom_attention_reference(
        x, params, heads=heads, dim_head=dim_head, num_landmarks=num_landmarks,
        pinv_iterations=pinv_iterations,
        residual_conv_kernel=residual_conv_kernel)
    ref = jax.block_until_ready(ref)

    np.testing.assert_allclose(np.asarray(out), np.asarray(ref),
                               rtol=1e-4, atol=1e-4)
    assert out.shape == (batch, seq, dim)
    print("KERNEL_OK")
</pallas_src>

<mosaic_0001>
module attributes {stable_mosaic.version = 11 : i64} {
  func.func @_matmul_kernel(%arg0: i32, %arg1: i32, %arg2: i32, %arg3: memref<32x32xf32, #tpu.memory_space<vmem>>, %arg4: memref<32x192xf32, #tpu.memory_space<vmem>>, %arg5: memref<32x192xf32, #tpu.memory_space<vmem>>, %arg6: memref<32x192xf32, #tpu.memory_space<vmem>>) attributes {dimension_semantics = [#tpu.dimension_semantics<parallel>, #tpu.dimension_semantics<parallel>, #tpu.dimension_semantics<arbitrary>], iteration_bounds = array<i64: 1, 1, 1>, scalar_prefetch = 0 : i64, scratch_operands = 1 : i64, tpu.core_type = #tpu.core_type<tc>, window_params = [{transform_indices = @transform_0, window_bounds = array<i64: 32, 32>}, {transform_indices = @transform_1, window_bounds = array<i64: 32, 192>}, {transform_indices = @transform_2, window_bounds = array<i64: 32, 192>}]} {
    %c0_i32 = arith.constant 0 : i32
    %0 = arith.cmpi eq, %arg2, %c0_i32 : i32
    %1 = arith.extui %0 : i1 to i32
    %c0_i32_0 = arith.constant 0 : i32
    %2 = arith.cmpi ne, %1, %c0_i32_0 : i32
    scf.if %2 {
      %cst_10 = arith.constant 0.000000e+00 : f32
      %12 = vector.broadcast %cst_10 : f32 to vector<32x192xf32>
      %c0_11 = arith.constant 0 : index
      %c0_12 = arith.constant 0 : index
      %13 = vector.load %arg6[%c0_11, %c0_12] : memref<32x192xf32, #tpu.memory_space<vmem>>, vector<32x192xf32>
      tpu.vector_store %arg6[%c0_11, %c0_12], %12 {strides = array<i32>} : memref<32x192xf32, #tpu.memory_space<vmem>>, vector<32x192xf32>,
    } else {
    }
    %c0 = arith.constant 0 : index
    %c0_1 = arith.constant 0 : index
    %3 = vector.load %arg6[%c0, %c0_1] : memref<32x192xf32, #tpu.memory_space<vmem>>, vector<32x192xf32>
    %c0_2 = arith.constant 0 : index
    %c0_3 = arith.constant 0 : index
    %4 = vector.load %arg3[%c0_2, %c0_3] : memref<32x32xf32, #tpu.memory_space<vmem>>, vector<32x32xf32>
    %c0_4 = arith.constant 0 : index
    %c0_5 = arith.constant 0 : index
    %5 = vector.load %arg4[%c0_4, %c0_5] : memref<32x192xf32, #tpu.memory_space<vmem>>, vector<32x192xf32>
    %cst = arith.constant dense<0.000000e+00> : vector<32x192xf32>
    %6 = tpu.matmul %4, %5, %cst {dimension_numbers = #tpu.dot_dimension_numbers<[1], [0], [0], [1], [0, 0, 1, 1], [], []>} : vector<32x32xf32>, vector<32x192xf32>, vector<32x192xf32> -> vector<32x192xf32>
    %7 = arith.addf %3, %6 : vector<32x192xf32>
    %c0_6 = arith.constant 0 : index
    %c0_7 = arith.constant 0 : index
    %8 = vector.load %arg6[%c0_6, %c0_7] : memref<32x192xf32, #tpu.memory_space<vmem>>, vector<32x192xf32>
    tpu.vector_store %arg6[%c0_6, %c0_7], %7 {strides = array<i32>} : memref<32x192xf32, #tpu.memory_space<vmem>>, vector<32x192xf32>,
    %c0_i32_8 = arith.constant 0 : i32
    %9 = arith.cmpi eq, %arg2, %c0_i32_8 : i32
    %10 = arith.extui %9 : i1 to i32
    %c0_i32_9 = arith.constant 0 : i32
    %11 = arith.cmpi ne, %10, %c0_i32_9 : i32
    scf.if %11 {
      %c0_10 = arith.constant 0 : index
      %c0_11 = arith.constant 0 : index
      %12 = vector.load %arg6[%c0_10, %c0_11] : memref<32x192xf32, #tpu.memory_space<vmem>>, vector<32x192xf32>
      %c0_12 = arith.constant 0 : index
      %c0_13 = arith.constant 0 : index
      %13 = vector.load %arg5[%c0_12, %c0_13] : memref<32x192xf32, #tpu.memory_space<vmem>>, vector<32x192xf32>
      tpu.vector_store %arg5[%c0_12, %c0_13], %12 {strides = array<i32>} : memref<32x192xf32, #tpu.memory_space<vmem>>, vector<32x192xf32>,
    } else {
    }
    return
  }
  func.func @transform_0(%arg0: i32, %arg1: i32, %arg2: i32) -> (i32, i32) {
    %c0_i32 = arith.constant 0 : i32
    return %arg0, %arg2 : i32, i32
  }
  func.func @transform_1(%arg0: i32, %arg1: i32, %arg2: i32) -> (i32, i32) {
    %c0_i32 = arith.constant 0 : i32
    return %arg2, %arg1 : i32, i32
  }
  func.func @transform_2(%arg0: i32, %arg1: i32, %arg2: i32) -> (i32, i32) {
    %c0_i32 = arith.constant 0 : i32
    return %arg0, %arg1 : i32, i32
  }
}

</mosaic_0001>

<bundles_post_ra>
// kernel: tpu_custom_call.1
= control target key start
LH: loop header
LB: loop body
LE: loop exit
PB: predicated region body
PF: predicated region fallthrough
CT: control target
= control target key end

     0   :  { %7 = vsyncpa [#allocation4], 0  ;;  %s402_s0 = inlined_call_operand.hbm [shape: f32[32,32], index: 0, kind: input, shape index: {}]   ;;  %s403_s1 = inlined_call_operand.hbm [shape: f32[32,192], index: 1, kind: input, shape index: {}]   ;;  %s404_s2 = inlined_call_operand.hbm [shape: f32[32,192], index: 2, kind: output, shape index: {}]  }
   0x1   :  { %8 = vsyncpa [#allocation7], 0 }
   0x2   :  { %9 = vsyncpa [#allocation5], 0  ;;  %s325_s9 = smov [#allocation3]   ;;  %s253_s13 = scalar_lea.hbm %s402_s0, 512 }
   0x3   :  { %s15_s10 = sshll.u32 %s325_s9, 4  ;;  %p254_p0 = scmp.ne.s32.totalorder %s402_s0, %s253_s13  ;;  %s16_s10 = int_to_ptr.vmem [resolvable:$true] %s15_s10 }
   0x4   :  { %p257_p1 = scmp.lt.u32.totalorder %s253_s13, %s402_s0 }
   0x6   :  { %p259_p2 = pnand %p257_p1, %p254_p0 }
   0x8   :  { %262 = shalt.err (!%p259_p2)
}
   0x9   :  { %s263_s18 = scalar_lea.vmem %s16_s10, 512  ;;  %p268_p4 = scmp.lt.s32.totalorder %s16_s10, %s16_s10 }
   0xa   :  { %p264_p3 = scmp.ne.s32.totalorder %s16_s10, %s263_s18  ;;  %p269_p5 = scmp.lt.s32.totalorder %s263_s18, %s263_s18 }
   0xc   :  { %p270_p6 = por %p269_p5, %p268_p4 }
   0xe   :  { %p271_p7 = pnand %p270_p6, %p264_p3 }
  0x10   :  { %274 = shalt.err (!%p271_p7)
}
  0x11   :  { %s326_s19 = smov 128   ;;  %s327_s20 = smov 8  }
  0x12   :  { %21 = dma.hbm_to_vmem [thread:$0]  %s402_s0, 512, %s16_s10, [#allocation4], %s326_s19, %s326_s19, %s327_s20  }
  0x13   :  { %s328_s23 = smov [#allocation6]   ;;  %s275_s27 = scalar_lea.hbm %s403_s1, 1024 }
  0x14   :  { %s27_s24 = sshll.u32 %s328_s23, 4  ;;  %p276_p8 = scmp.ne.s32.totalorder %s403_s1, %s275_s27  ;;  %s28_s24 = int_to_ptr.vmem [resolvable:$true] %s27_s24 }
  0x15   :  { %p279_p9 = scmp.lt.u32.totalorder %s275_s27, %s403_s1 }
  0x17   :  { %p281_p10 = pnand %p279_p9, %p276_p8 }
  0x19   :  { %284 = shalt.err (!%p281_p10)
}
  0x1a   :  { %s285_s4 = scalar_lea.vmem %s28_s24, 1024  ;;  %p290_p12 = scmp.lt.s32.totalorder %s28_s24, %s28_s24 }
  0x1b   :  { %p286_p11 = scmp.ne.s32.totalorder %s28_s24, %s285_s4  ;;  %p291_p13 = scmp.lt.s32.totalorder %s285_s4, %s285_s4 }
  0x1d   :  { %p292_p0 = por %p291_p13, %p290_p12 }
  0x1f   :  { %p293_p1 = pnand %p292_p0, %p286_p11 }
  0x21   :  { %296 = shalt.err (!%p293_p1)
}
  0x22   :  { %s329_s0 = smov 256   ;;  %s330_s5 = smov 16  }
  0x23   :  { %33 = dma.hbm_to_vmem [thread:$0]  %s403_s1, 1024, %s28_s24, [#allocation7], %s329_s0, %s329_s0, %s330_s5  }
  0x24   :  { %319 = dma.done.wait [#allocation4], 512  }
  0x25   :  { %320 = vsyncadd [#allocation4], 4294966784 }
  0x26   :  { %321 = dma.done.wait [#allocation7], 1024  }
  0x27   :  { %322 = vsyncadd [#allocation7], 4294966272  ;;  %v331_v0 = vmov 0.0   ;;  %v66_v1 = vld [vmem:[#allocation6 + $0x8] sm:$0xff]  ;;  %v68_v2 = vld [vmem:[#allocation6 + $0x18] sm:$0xff]  ;;  %vm73_vm0 = vcmask 261120  }
  0x28   :  { %150 = vmatprep.mubr.f32.mxu0 %v331_v0  ;;  %162 = vmatprep.mubr.f32.mxu1 %v331_v0  ;;  %v65_v3 = vld [vmem:[#allocation6] sm:$0xff]  ;;  %v233_v4 = vpack.c.bf16 %v68_v2, %v66_v1  ;;  %v67_v5 = vld [vmem:[#allocation6 + $0x10] sm:$0xff]  ;;  %v70_v6 = vld [vmem:[#allocation6 + $0x28] sm:$0xff]  ;;  %vm45_vm1 = vcmask 523264   ;;  %s332_s1 = smov [#allocation8]  }
  0x29   :  { %v72_v7 = vld [vmem:[#allocation6 + $0x38] sm:$0xff]  ;;  %v235_v8 = vpack.c.bf16 %v67_v5, %v65_v3  ;;  %v69_v10 = vld [vmem:[#allocation6 + $0x20] sm:$0xff]  ;;  %v71_v11 = vld [vmem:[#allocation6 + $0x30] sm:$0xff]  ;;  %46 = vst.msk [vmem:[#allocation2 + $0x8] sm:$0xff] %vm45_vm1, %v331_v0  ;;  %s216_s8 = sshll.u32 %s332_s1, 4  ;;  %s217_s8 = int_to_ptr.vmem [resolvable:$true] %s216_s8 }
  0x2a   :  { %v237_v9 = vpack.c.bf16 %v72_v7, %v70_v6  ;;  %234 = vmatprep.subr.bf16.mxu0 %v233_v4  ;;  %241 = vmatprep.subr.bf16.mxu1 %v233_v4  ;;  %v239_v12 = vpack.c.bf16 %v71_v11, %v69_v10  ;;  %v61_v13 = vld [vmem:[#allocation3] sm:$0xff]  ;;  %v63_v14 = vld [vmem:[#allocation3 + $0x10] sm:$0xff]  ;;  %v62_v15 = vld [vmem:[#allocation3 + $0x8] sm:$0xff]  ;;  %48 = vst.msk [vmem:[#allocation2 + $0x18] sm:$0xff] %vm45_vm1, %v331_v0  ;;  %s297_s9 = scalar_lea.vmem %s217_s8, 1024  ;;  %p302_p3 = scmp.lt.s32.totalorder %s217_s8, %s217_s8 }
  0x2b   :  { %236 = vmatpush1.bf16.msra.mxu0 %v235_v8  ;;  %243 = vmatpush1.bf16.msra.mxu1 %v235_v8  ;;  %v64_v16 = vld [vmem:[#allocation3 + $0x18] sm:$0xff]  ;;  %50 = vst.msk [vmem:[#allocation2 + $0x28] sm:$0xff] %vm45_vm1, %v331_v0  ;;  %52 = vst.msk [vmem:[#allocation2 + $0x38] sm:$0xff] %vm45_vm1, %v331_v0  ;;  %p298_p2 = scmp.ne.s32.totalorder %s217_s8, %s297_s9  ;;  %p303_p4 = scmp.lt.s32.totalorder %s297_s9, %s297_s9 }
  0x2c   :  { %238 = vmatprep.subr.bf16.mxu0 %v237_v9  ;;  %242 = vmatprep.subr.bf16.mxu1 %v237_v9 }
  0x2d   :  { %p304_p5 = por %p303_p4, %p302_p3 }
  0x2f   :  { %240 = vmatpush1.bf16.msra.mxu0 %v239_v12  ;;  %244 = vmatpush1.bf16.msra.mxu1 %v239_v12  ;;  %p305_p6 = pnand %p304_p5, %p298_p2 }
  0x30   :  { %v54_v17 = vld [vmem:[#allocation2 + $0x8] sm:$0xff] }
  0x31   :  { %v56_v25 = vld [vmem:[#allocation2 + $0x18] sm:$0xff] }
  0x32   :  { %229 = vmatmul.mubr.msk.f32.vlgmr.msra.gmra.mrb[0].mxu0 %vm73_vm0, %v61_v13  ;;  %231 = vmatmul.mubr.msk.f32.vlgmr.msra.gmra.mrb[0].mxu1 %vm73_vm0, %v63_v14  ;;  %v58_v18 = vld [vmem:[#allocation2 + $0x28] sm:$0xff]  ;;  %v60_v26 = vld [vmem:[#allocation2 + $0x38] sm:$0xff] }
  0x33   :  { %156 = vmatprep.mubr.f32.mxu0 %v331_v0  ;;  %168 = vmatprep.mubr.f32.mxu1 %v331_v0 }
  0x36   :  { %230 = vmatmul.mubr.msk.f32.gmra.mrb[2].mxu0 %vm73_vm0, %v62_v15  ;;  %232 = vmatmul.mubr.msk.f32.gmra.mrb[2].mxu1 %vm73_vm0, %v64_v16 }
 0x105   :  { %v152_v19 = vpop.f32.mrb[0].mxu0  ;;  %v164_v20 = vpop.f32.mrb[0].mxu1 }
 0x106   :  { %v154_v21 = vpop.f32.mrb[1].mxu0  ;;  %v166_v22 = vpop.f32.mrb[1].mxu1  ;;  %203 = vst [vmem:[#allocation8] sm:$0xff] %v152_v19  ;;  %207 = vst [vmem:[#allocation8 + $0x20] sm:$0xff] %v164_v20 }
 0x107   :  { %v176_v23 = vadd.f32 %v154_v21, %v54_v17  ;;  %v180_v24 = vadd.f32 %v166_v22, %v58_v18 }
 0x109   :  { %185 = vst.msk [vmem:[#allocation2 + $0x8] sm:$0xff] %vm45_vm1, %v176_v23  ;;  %189 = vst.msk [vmem:[#allocation2 + $0x28] sm:$0xff] %vm45_vm1, %v180_v24  ;;  %v158_v27 = vpop.f32.mrb[2].mxu0  ;;  %v170_v28 = vpop.f32.mrb[2].mxu1 }
 0x10a   :  { %v160_v29 = vpop.f32.mrb[3].mxu0  ;;  %v172_v30 = vpop.f32.mrb[3].mxu1  ;;  %205 = vst [vmem:[#allocation8 + $0x10] sm:$0xff] %v158_v27  ;;  %209 = vst [vmem:[#allocation8 + $0x30] sm:$0xff] %v170_v28 }
 0x10b   :  { %v178_v31 = vadd.f32 %v160_v29, %v56_v25  ;;  %v182_v32 = vadd.f32 %v172_v30, %v60_v26 }
 0x10d   :  { %187 = vst.msk [vmem:[#allocation2 + $0x18] sm:$0xff] %vm45_vm1, %v178_v31  ;;  %191 = vst.msk [vmem:[#allocation2 + $0x38] sm:$0xff] %vm45_vm1, %v182_v32 }
 0x110   :  { %v196_v33 = vld [vmem:[#allocation2 + $0x8] sm:$0xff] }
 0x111   :  { %v200_v34 = vld [vmem:[#allocation2 + $0x28] sm:$0xff]  ;;  %204 = vst.msk [vmem:[#allocation8 + $0x8] sm:$0xff] %vm45_vm1, %v196_v33 }
 0x112   :  { %208 = vst.msk [vmem:[#allocation8 + $0x28] sm:$0xff] %vm45_vm1, %v200_v34 }
 0x114   :  { %v198_v35 = vld [vmem:[#allocation2 + $0x18] sm:$0xff] }
 0x115   :  { %v202_v36 = vld [vmem:[#allocation2 + $0x38] sm:$0xff]  ;;  %206 = vst.msk [vmem:[#allocation8 + $0x18] sm:$0xff] %vm45_vm1, %v198_v35 }
 0x116   :  { %210 = vst.msk [vmem:[#allocation8 + $0x38] sm:$0xff] %vm45_vm1, %v202_v36 }
 0x117   :  { %308 = shalt.err (!%p305_p6)
}
 0x118   :  { %s309_s12 = scalar_lea.hbm %s404_s2, 1024 }
 0x119   :  { %p310_p7 = scmp.ne.s32.totalorder %s404_s2, %s309_s12  ;;  %p313_p8 = scmp.lt.u32.totalorder %s309_s12, %s404_s2 }
 0x11b   :  { %p315_p9 = pnand %p313_p8, %p310_p7 }
 0x11d   :  { %318 = shalt.err (!%p315_p9)
}
 0x11e   :  { %222 = dma.vmem_to_hbm [thread:$0]  %s217_s8, 1024, %s404_s2, [#allocation5], %s329_s0, %s329_s0, %s330_s5  }
 0x11f   :  { %323 = dma.done.wait [#allocation5], 1024  }
 0x120   :  { %324 = vsyncadd [#allocation5], 4294966272 }
 0x121   :  { %226 = vsyncpa [#allocation4], 1 }
 0x122   :  { %227 = vsyncpa [#allocation7], 1 }
 0x123   :  { %228 = vsyncpa [#allocation5], 1 }

</bundles_post_ra>
